<compile_context>
chip_gen: v7x
topology: tpu7x:2x2x1
jax: 0.10.0
libtpu: 0.0.40
codegen_flags: <defaults>
</compile_context>

<pallas_src>
import jax
import jax.numpy as jnp
from jax.experimental import pallas as pl
from jax.experimental.pallas import tpu as pltpu


# ----------------------------------------------------------------------------
# VMEM / tiling helpers
# ----------------------------------------------------------------------------

def _sublane_granule(itemsize):
    # rows packed per (8,128) tile along the second-to-last dim:
    # f32 -> 8, bf16 -> 16, int8/fp8 -> 32
    return 8 * max(1, 4 // int(itemsize))


def _rup(x, g):
    return ((x + g - 1) // g) * g


def _vmem_need_bytes(ct, n_ctx, n_suffix, seq_len, d, itemsize):
    """Per-grid-step VMEM footprint: sublane padding + x2 double-buffering of
    every streamed block (prefix, suffix, out) plus the resident ctx/pos."""
    g = _sublane_granule(itemsize)
    prefix_blk = _rup(ct, g) * d * itemsize               # (ct, D)
    suffix_blk = ct * _rup(n_suffix, g) * d * itemsize    # (ct, S, D)
    out_blk = ct * _rup(seq_len, g) * d * itemsize        # (ct, seq_len, D)
    resident = (_rup(n_ctx, g) + _rup(seq_len, g)) * d * itemsize  # ctx + pos
    return 2 * (prefix_blk + suffix_blk + out_blk + resident)


def _vmem_block_budget_bytes():
    cap = 64 * 1024 * 1024  # conservative fallback: v7x physical VMEM
    try:
        cap = int(pltpu.get_tpu_info().vmem_capacity_bytes)
    except Exception:
        pass
    # stay comfortably inside every generation's scoped-VMEM default
    return min(cap // 4, 24 * 1024 * 1024)


def _num_tensorcores():
    try:
        dev = jax.devices()[0]
        nc = getattr(dev, "num_cores", None)
        if nc:
            return int(nc)
        if "v7" in str(getattr(dev, "device_kind", "")).lower():
            return 2
    except Exception:
        pass
    return 1


def _pick_class_tile(n_cls, n_ctx, n_suffix, seq_len, d, itemsize):
    budget = _vmem_block_budget_bytes()

    def need(c):
        return _vmem_need_bytes(c, n_ctx, n_suffix, seq_len, d, itemsize)

    def shrink(c):
        return max(8, ((c // 2) // 8) * 8)   # keep multiples of 8 when splitting

    ct = n_cls
    while ct > 8 and need(ct) > budget:
        ct = shrink(ct)

    # Multi-TensorCore chips (v7x): aim for >=2 grid steps per core so the
    # BlockSpec pipeline has something to overlap, but only while per-step
    # output blocks stay >= ~2 MiB (measured HBM-roofline plateau).
    ncores = _num_tensorcores()
    if ncores > 1:
        g = _sublane_granule(itemsize)
        target_steps = 2 * ncores
        while ct > 8:
            if pl.cdiv(n_cls, ct) >= target_steps:
                break
            smaller = shrink(ct)
            if smaller * _rup(seq_len, g) * d * itemsize < (2 << 20):
                break
            ct = smaller
    return max(1, min(ct, n_cls))


# ----------------------------------------------------------------------------
# Kernel 1: full prompt assembly (matches the torch forward() exactly)
# ----------------------------------------------------------------------------

def _prompt_assemble_kernel(prefix_ref, ctx_ref, suffix_ref, pos_ref, out_ref):
    # prefix_ref : (CT, D)         per-class SOS embedding (token dim squeezed)
    # ctx_ref    : (n_ctx, D)      shared learnable context
    # suffix_ref : (CT, S, D)      per-class classname/EOS/pad embeddings
    # pos_ref    : (seq_len, D)    positional embedding (zeros => plain concat)
    # out_ref    : (CT, seq_len, D)
    ct, d = prefix_ref.shape
    n_ctx = ctx_ref.shape[0]
    ctx_b = jnp.broadcast_to(ctx_ref[...][None, :, :], (ct, n_ctx, d))
    slab = jnp.concatenate(
        [prefix_ref[...][:, None, :], ctx_b, suffix_ref[...]], axis=1)
    slab = slab + pos_ref[...][None, :, :]   # fused add; zeros => identity
    out_ref[...] = slab.astype(out_ref.dtype)


def prompt_learner_forward(token_prefix, ctx, token_suffix,
                           positional_embedding=None, class_tile=None):
    """Pallas implementation of PromptLearner.forward().

    token_prefix : (n_cls, 1, D)   frozen SOS-token embeddings
    ctx          : (n_ctx, D)      learnable generic context (ctx.dim()==2 path)
    token_suffix : (n_cls, S, D)   frozen classname/EOS/pad embeddings
    positional_embedding : optional (1+n_ctx+S, D); fused into the output
    returns      : (n_cls, 1 + n_ctx + S, D)
    """
    n_cls, one, d = token_prefix.shape
    assert one == 1
    n_ctx = ctx.shape[0]
    n_suffix = token_suffix.shape[1]
    seq_len = 1 + n_ctx + n_suffix
    dtype = token_prefix.dtype
    itemsize = int(jnp.dtype(dtype).itemsize)

    # Squeeze the size-1 token dim: (class_tile, D) blocks are sublane-dense.
    prefix2d = token_prefix.reshape(n_cls, d)
    ctx = ctx.astype(dtype)
    suffix = token_suffix.astype(dtype)
    pos = (jnp.zeros((seq_len, d), dtype) if positional_embedding is None
           else positional_embedding.astype(dtype))
    assert pos.shape == (seq_len, d)

    if class_tile is None:
        class_tile = _pick_class_tile(n_cls, n_ctx, n_suffix, seq_len, d, itemsize)
    class_tile = int(max(1, min(class_tile, n_cls)))
    grid = (pl.cdiv(n_cls, class_tile),)

    need = _vmem_need_bytes(class_tile, n_ctx, n_suffix, seq_len, d, itemsize)
    vmem_limit = int(min(max(2 * need + (2 << 20), 32 << 20), 96 << 20))

    bytes_accessed = itemsize * (
        n_cls * d + n_ctx * d + n_cls * n_suffix * d + seq_len * d
        + n_cls * seq_len * d)
    cost = pl.CostEstimate(flops=n_cls * seq_len * d, transcendentals=0,
                           bytes_accessed=bytes_accessed)

    return pl.pallas_call(
        _prompt_assemble_kernel,
        out_shape=jax.ShapeDtypeStruct((n_cls, seq_len, d), dtype),
        grid_spec=pltpu.PrefetchScalarGridSpec(
            num_scalar_prefetch=0,
            grid=grid,
            in_specs=[
                pl.BlockSpec((class_tile, d), lambda i: (i, 0)),              # prefix
                pl.BlockSpec((n_ctx, d), lambda i: (0, 0)),                   # ctx (resident)
                pl.BlockSpec((class_tile, n_suffix, d), lambda i: (i, 0, 0)), # suffix
                pl.BlockSpec((seq_len, d), lambda i: (0, 0)),                 # pos (resident)
            ],
            out_specs=pl.BlockSpec((class_tile, seq_len, d), lambda i: (i, 0, 0)),
        ),
        compiler_params=pltpu.CompilerParams(
            dimension_semantics=("parallel",),
            vmem_limit_bytes=vmem_limit),
        cost_estimate=cost,
    )(prefix2d, ctx, suffix, pos)


# ----------------------------------------------------------------------------
# Kernel 2: aliased in-place variant (writes ONLY the n_ctx context rows)
# ----------------------------------------------------------------------------

def _ctx_inplace_kernel(base_hbm_ref, ctx_ref, out_hbm_ref, slab_ref, sem_ref):
    # base_hbm_ref / out_hbm_ref : (n_cls, seq_len, D) same HBM buffer (aliased)
    # ctx_ref                    : (n_ctx, D) in VMEM (resident)
    # slab_ref                   : (CT, n_ctx, D) VMEM staging buffer
    del base_hbm_ref  # frozen prefix/suffix rows are left untouched in HBM
    n_cls = out_hbm_ref.shape[0]
    ct, n_ctx, d = slab_ref.shape
    i = pl.program_id(0)
    # Clamp so a ragged last tile overlaps the previous one (identical values)
    # instead of issuing an out-of-bounds DMA.
    start = jnp.minimum(i * ct, n_cls - ct)
    slab_ref[...] = jnp.broadcast_to(ctx_ref[...][None, :, :], (ct, n_ctx, d))
    cp = pltpu.make_async_copy(
        slab_ref,
        out_hbm_ref.at[pl.ds(start, ct), pl.ds(1, n_ctx), :],
        sem_ref)
    cp.start()
    cp.wait()


def prompt_learner_forward_inplace(base_prompts, ctx, class_tile=None):
    """In-place forward: `base_prompts` already holds the frozen token_prefix /
    token_suffix rows (context rows may hold anything); only the n_ctx context
    rows are rewritten.  HBM traffic ~= n_ctx rows/class instead of
    ~(1 + n_suffix + seq_len) rows/class.  Call under jit with the prompts
    buffer donated (see __main__)."""
    n_cls, seq_len, d = base_prompts.shape
    n_ctx = ctx.shape[0]
    dtype = base_prompts.dtype
    if class_tile is None:
        class_tile = min(n_cls, 128)
    class_tile = int(max(1, min(class_tile, n_cls)))
    grid = (pl.cdiv(n_cls, class_tile),)

    return pl.pallas_call(
        _ctx_inplace_kernel,
        out_shape=jax.ShapeDtypeStruct((n_cls, seq_len, d), dtype),
        grid=grid,
        in_specs=[
            pl.BlockSpec(memory_space=pl.ANY),            # aliased prompts buffer
            pl.BlockSpec((n_ctx, d), lambda i: (0, 0)),   # shared ctx (resident)
        ],
        out_specs=pl.BlockSpec(memory_space=pl.ANY),
        scratch_shapes=[
            pltpu.VMEM((class_tile, n_ctx, d), dtype),
            pltpu.SemaphoreType.DMA(()),
        ],
        input_output_aliases={0: 0},
        compiler_params=pltpu.CompilerParams(
            dimension_semantics=("arbitrary",),
            has_side_effects=True),
    )(base_prompts, ctx.astype(dtype))


# ----------------------------------------------------------------------------
# Reference + self-test
# ----------------------------------------------------------------------------

def reference_forward(token_prefix, ctx, token_suffix):
    n_cls = token_prefix.shape[0]
    ctx_e = jnp.broadcast_to(ctx[None, :, :], (n_cls,) + ctx.shape)
    return jnp.concatenate([token_prefix, ctx_e, token_suffix], axis=1)


if __name__ == "__main__":
    key = jax.random.PRNGKey(0)
    k_ctx, k_pre, k_suf, k_pos, k_bias, k_w = jax.random.split(key, 6)

    n_cls, n_ctx, ctx_dim, n_suffix = 4, 4, 128, 11
    seq_len = 1 + n_ctx + n_suffix
    dtype = jnp.float32

    # nn.init.normal_(std=0.02) learnable context; frozen CLIP embeddings are
    # synthesized (see TODO at top).
    ctx = (0.02 * jax.random.normal(k_ctx, (n_ctx, ctx_dim))).astype(dtype)
    token_prefix = jax.random.normal(k_pre, (n_cls, 1, ctx_dim)).astype(dtype)
    token_suffix = jax.random.normal(k_suf, (n_cls, n_suffix, ctx_dim)).astype(dtype)
    pos_emb = (0.01 * jax.random.normal(k_pos, (seq_len, ctx_dim))).astype(dtype)

    # Other __init__ parameters (unused by forward, created for shape parity):
    bias_vectors = (0.02 * jax.random.normal(k_bias, (1, 512))).astype(dtype)
    meta_net_w = (0.02 * jax.random.normal(k_w, (512, 512))).astype(dtype)
    meta_net_b = jnp.zeros((512,), dtype)

    expected = reference_forward(token_prefix, ctx, token_suffix)

    # 1) plain forward (matches the torch module exactly)
    prompts = jax.block_until_ready(
        prompt_learner_forward(token_prefix, ctx, token_suffix))
    assert prompts.shape == (n_cls, seq_len, ctx_dim)
    assert jnp.allclose(prompts, expected), "plain forward mismatch"

    # 2) fused positional-embedding add (free VALU work under DMA)
    prompts_pos = jax.block_until_ready(
        prompt_learner_forward(token_prefix, ctx, token_suffix,
                               positional_embedding=pos_emb))
    assert jnp.allclose(prompts_pos, expected + pos_emb[None, :, :], atol=1e-6), \
        "fused pos-emb mismatch"

    # 3) ragged last class-tile + bf16 (exercises masked writeback of the
    #    final output block; pure copy so bf16 is exact)
    n_cls_r = 12
    tp_r = jax.random.normal(k_pre, (n_cls_r, 1, ctx_dim)).astype(jnp.bfloat16)
    ts_r = jax.random.normal(k_suf, (n_cls_r, n_suffix, ctx_dim)).astype(jnp.bfloat16)
    ctx_r = ctx.astype(jnp.bfloat16)
    out_r = jax.block_until_ready(
        prompt_learner_forward(tp_r, ctx_r, ts_r, class_tile=8))
    exp_r = reference_forward(tp_r, ctx_r, ts_r)
    assert jnp.array_equal(out_r, exp_r), "ragged/bf16 forward mismatch"

    # 4) aliased in-place variant: frozen prefix+suffix pre-assembled once,
    #    only the n_ctx context rows written per call (buffer donated).
    base = reference_forward(token_prefix, jnp.zeros_like(ctx), token_suffix)
    inplace_fn = jax.jit(prompt_learner_forward_inplace, donate_argnums=(0,))
    prompts_ip = jax.block_until_ready(inplace_fn(base, ctx))
    assert jnp.allclose(prompts_ip, expected), "in-place forward mismatch"

    print("KERNEL_OK")
</pallas_src>

<mosaic_0001>
module attributes {stable_mosaic.version = 11 : i64} {
  func.func @_prompt_assemble_kernel(%arg0: i32, %arg1: memref<4x128xf32, #tpu.memory_space<vmem>>, %arg2: memref<4x128xf32, #tpu.memory_space<vmem>>, %arg3: memref<4x11x128xf32, #tpu.memory_space<vmem>>, %arg4: memref<16x128xf32, #tpu.memory_space<vmem>>, %arg5: memref<4x16x128xf32, #tpu.memory_space<vmem>>) attributes {dimension_semantics = [#tpu.dimension_semantics<parallel>], iteration_bounds = array<i64: 1>, scalar_prefetch = 0 : i64, scratch_operands = 0 : i64, tpu.core_type = #tpu.core_type<tc>, window_params = [{transform_indices = @transform_0, window_bounds = array<i64: 4, 128>}, {pipeline_mode = #tpu.pipeline_mode<synchronous>, transform_indices = @transform_1, window_bounds = array<i64: 4, 128>}, {transform_indices = @transform_2, window_bounds = array<i64: 4, 11, 128>}, {pipeline_mode = #tpu.pipeline_mode<synchronous>, transform_indices = @transform_3, window_bounds = array<i64: 16, 128>}, {transform_indices = @transform_4, window_bounds = array<i64: 4, 16, 128>}]} {
    %c0 = arith.constant 0 : index
    %c0_0 = arith.constant 0 : index
    %0 = vector.load %arg2[%c0, %c0_0] : memref<4x128xf32, #tpu.memory_space<vmem>>, vector<4x128xf32>
    %1 = vector.shape_cast %0 : vector<4x128xf32> to vector<1x4x128xf32>
    %2 = vector.shape_cast %1 : vector<1x4x128xf32> to vector<1x4x128xf32>
    %3 = vector.broadcast %2 : vector<1x4x128xf32> to vector<4x4x128xf32>
    %c0_1 = arith.constant 0 : index
    %c0_2 = arith.constant 0 : index
    %4 = vector.load %arg1[%c0_1, %c0_2] : memref<4x128xf32, #tpu.memory_space<vmem>>, vector<4x128xf32>
    %5 = vector.shape_cast %4 : vector<4x128xf32> to vector<4x1x128xf32>
    %c0_3 = arith.constant 0 : index
    %c0_4 = arith.constant 0 : index
    %c0_5 = arith.constant 0 : index
    %6 = vector.load %arg3[%c0_3, %c0_4, %c0_5] : memref<4x11x128xf32, #tpu.memory_space<vmem>>, vector<4x11x128xf32>
    %7 = tpu.concatenate %5, %3, %6 in 1 : vector<4x1x128xf32>, vector<4x4x128xf32>, vector<4x11x128xf32> -> vector<4x16x128xf32>
    %c0_6 = arith.constant 0 : index
    %c0_7 = arith.constant 0 : index
    %8 = vector.load %arg4[%c0_6, %c0_7] : memref<16x128xf32, #tpu.memory_space<vmem>>, vector<16x128xf32>
    %9 = vector.shape_cast %8 : vector<16x128xf32> to vector<1x16x128xf32>
    %10 = vector.broadcast %9 : vector<1x16x128xf32> to vector<4x16x128xf32>
    %11 = arith.addf %7, %10 : vector<4x16x128xf32>
    %c0_8 = arith.constant 0 : index
    %c0_9 = arith.constant 0 : index
    %c0_10 = arith.constant 0 : index
    %12 = vector.load %arg5[%c0_8, %c0_9, %c0_10] : memref<4x16x128xf32, #tpu.memory_space<vmem>>, vector<4x16x128xf32>
    tpu.vector_store %arg5[%c0_8, %c0_9, %c0_10], %11 {strides = array<i32>} : memref<4x16x128xf32, #tpu.memory_space<vmem>>, vector<4x16x128xf32>,
    return
  }
  func.func @transform_0(%arg0: i32) -> (i32, i32) {
    %c0_i32 = arith.constant 0 : i32
    %c0_i32_0 = arith.constant 0 : i32
    return %arg0, %c0_i32 : i32, i32
  }
  func.func @transform_1(%arg0: i32) -> (i32, i32) {
    %c0_i32 = arith.constant 0 : i32
    %c0_i32_0 = arith.constant 0 : i32
    %c0_i32_1 = arith.constant 0 : i32
    return %c0_i32, %c0_i32_0 : i32, i32
  }
  func.func @transform_2(%arg0: i32) -> (i32, i32, i32) {
    %c0_i32 = arith.constant 0 : i32
    %c0_i32_0 = arith.constant 0 : i32
    %c0_i32_1 = arith.constant 0 : i32
    return %arg0, %c0_i32, %c0_i32_0 : i32, i32, i32
  }
  func.func @transform_3(%arg0: i32) -> (i32, i32) {
    %c0_i32 = arith.constant 0 : i32
    %c0_i32_0 = arith.constant 0 : i32
    %c0_i32_1 = arith.constant 0 : i32
    return %c0_i32, %c0_i32_0 : i32, i32
  }
  func.func @transform_4(%arg0: i32) -> (i32, i32, i32) {
    %c0_i32 = arith.constant 0 : i32
    %c0_i32_0 = arith.constant 0 : i32
    %c0_i32_1 = arith.constant 0 : i32
    return %arg0, %c0_i32, %c0_i32_0 : i32, i32, i32
  }
}

</mosaic_0001>

<bundles_post_ra>
// kernel: tpu_custom_call.1
= control target key start
LH: loop header
LB: loop body
LE: loop exit
PB: predicated region body
PF: predicated region fallthrough
CT: control target
= control target key end

     0   :  { %v32_v2 = vlaneseq  ;;  %v161_v4 = vmov 1966171168   ;;  %vm68_vm0 = vcmask 1044480   ;;  %s250_s0 = inlined_call_operand.vmem [shape: f32[4,128], index: 0, kind: input, shape index: {}]   ;;  %s251_s1 = inlined_call_operand.vmem [shape: f32[4,128], index: 1, kind: input, shape index: {}]   ;;  %s252_s2 = inlined_call_operand.vmem [shape: f32[4,11,128], index: 2, kind: input, shape index: {}]   ;;  %s253_s3 = inlined_call_operand.vmem [shape: f32[16,128], index: 3, kind: input, shape index: {}]   ;;  %s254_s4 = inlined_call_operand.hbm [shape: f32[4,16,128], index: 4, kind: output, shape index: {}]  }
   0x1   :  { %v18_v0 = vld [vmem:[%s251_s1] sm:$0xf]  ;;  %v30_v5 = vunpack.c.l.s4 %v161_v4  ;;  %v50_v8 = vld [vmem:[%s252_s2 + $0x8] sm:$0x7]  ;;  %v51_v13 = vld [vmem:[%s252_s2 + $0x10] sm:$0xff] }
   0x2   :  { %v132_v1 = vld.sshfl [vmem:[%s250_s0] sm:$0x33 pattern:$0x75316420]  ;;  %v33_v6 = vshrl.u32 %v32_v2, 7  ;;  %v99_v9 = vld [vmem:[%s253_s3 + $0x8] sm:$0xff] }
   0x3   :  { %v49_v3 = vld [vmem:[%s252_s2] sm:$0xff]  ;;  %v58_v10 = vrot.slane %v18_v0, 7  ;;  %v70_v11 = vrot.slane %v50_v8, 3  ;;  %v28_v12 = vcombine.high %v132_v1, %v132_v1  ;;  %v52_v14 = vld [vmem:[%s252_s2 + $0x18] sm:$0x7]  ;;  %v31_v16 = vunpack.c.0.s8 %v30_v5  ;;  %v55_v21 = vld [vmem:[%s252_s2 + $0x30] sm:$0xff] }
   0x4   :  { %v69_v7 = vrot.slane %v49_v3, 3  ;;  %v53_v15 = vld [vmem:[%s252_s2 + $0x20] sm:$0xff]  ;;  %v72_v17 = vrot.slane %v51_v13, 3  ;;  %v73_v18 = vrot.slane %v52_v14, 3  ;;  %v54_v20 = vld [vmem:[%s252_s2 + $0x28] sm:$0x7] }
   0x5   :  { %v75_v19 = vrot.slane %v53_v15, 3  ;;  %v76_v23 = vrot.slane %v54_v20, 3  ;;  %v78_v24 = vrot.slane %v55_v21, 3  ;;  %v56_v25 = vld [vmem:[%s252_s2 + $0x38] sm:$0x7] }
   0x6   :  { %v71_v22 = vsel %vm68_vm0, %v69_v7, %v70_v11 }
   0x7   :  { %9 = vsyncpa [#allocation3], 0  ;;  %v34_v26 = vsub.s32 %v31_v16, %v33_v6  ;;  %v101_v27 = vadd.f32 %v99_v9, %v71_v22  ;;  %v74_v28 = vsel %vm68_vm0, %v72_v17, %v73_v18  ;;  %v79_v29 = vrot.slane %v56_v25, 3  ;;  %v98_v36 = vld [vmem:[%s253_s3] sm:$0xff]  ;;  %s162_s2 = smov [#allocation2]  }
   0x8   :  { %vm89_vm1 = vcmask 1040384   ;;  %v103_v30 = vadd.f32 %v99_v9, %v74_v28  ;;  %v77_v31 = vsel %vm68_vm0, %v75_v19, %v76_v23  ;;  %s121_s11 = sshll.u32 %s162_s2, 4  ;;  %s122_s11 = int_to_ptr.vmem [resolvable:$true] %s121_s11 }
   0x9   :  { %v35_v32 = vrot.slane %v132_v1, %v34_v26  ;;  %109 = vst [vmem:[#allocation2 + $0x8] sm:$0xff] %v101_v27  ;;  %v42_v33 = vrot.slane %v28_v12, %v34_v26  ;;  %v105_v34 = vadd.f32 %v99_v9, %v77_v31  ;;  %v80_v35 = vsel %vm68_vm0, %v78_v24, %v79_v29  ;;  %s137_s3 = scalar_lea.vmem %s122_s11, 1024  ;;  %p142_p1 = scmp.lt.s32.totalorder %s122_s11, %s122_s11 }
   0xa   :  { %111 = vst [vmem:[#allocation2 + $0x18] sm:$0xff] %v103_v30  ;;  %v107_v37 = vadd.f32 %v99_v9, %v80_v35  ;;  %p138_p0 = scmp.ne.s32.totalorder %s122_s11, %s137_s3  ;;  %p143_p2 = scmp.lt.s32.totalorder %s137_s3, %s137_s3 }
   0xb   :  { %v90_v38 = vsel %vm89_vm1, %v35_v32, %v58_v10  ;;  %v91_v39 = vsel %vm89_vm1, %v42_v33, %v58_v10  ;;  %v43_v40 = vcombine.high %v35_v32, %v35_v32  ;;  %113 = vst [vmem:[#allocation2 + $0x28] sm:$0xff] %v105_v34  ;;  %v44_v41 = vcombine.high %v42_v33, %v42_v33 }
   0xc   :  { %v94_v42 = vsel %vm68_vm0, %v90_v38, %v69_v7  ;;  %v95_v43 = vsel %vm68_vm0, %v91_v39, %v72_v17  ;;  %115 = vst [vmem:[#allocation2 + $0x38] sm:$0xff] %v107_v37  ;;  %p144_p3 = por %p143_p2, %p142_p1 }
   0xd   :  { %v100_v44 = vadd.f32 %v98_v36, %v94_v42  ;;  %v102_v45 = vadd.f32 %v98_v36, %v95_v43  ;;  %v92_v46 = vsel %vm89_vm1, %v43_v40, %v58_v10  ;;  %v93_v47 = vsel %vm89_vm1, %v44_v41, %v58_v10 }
   0xe   :  { %v96_v48 = vsel %vm68_vm0, %v92_v46, %v75_v19  ;;  %v97_v49 = vsel %vm68_vm0, %v93_v47, %v78_v24  ;;  %p145_p4 = pnand %p144_p3, %p138_p0 }
   0xf   :  { %108 = vst [vmem:[#allocation2] sm:$0xff] %v100_v44  ;;  %110 = vst [vmem:[#allocation2 + $0x10] sm:$0xff] %v102_v45  ;;  %v104_v50 = vadd.f32 %v98_v36, %v96_v48  ;;  %v106_v51 = vadd.f32 %v98_v36, %v97_v49 }
  0x11   :  { %112 = vst [vmem:[#allocation2 + $0x20] sm:$0xff] %v104_v50  ;;  %114 = vst [vmem:[#allocation2 + $0x30] sm:$0xff] %v106_v51 }
  0x12   :  { %148 = shalt.err (!%p145_p4)
}
  0x13   :  { %s149_s14 = scalar_lea.hbm %s254_s4, 1024 }
  0x14   :  { %p150_p5 = scmp.ne.s32.totalorder %s254_s4, %s149_s14  ;;  %p153_p6 = scmp.lt.u32.totalorder %s149_s14, %s254_s4 }
  0x16   :  { %p155_p7 = pnand %p153_p6, %p150_p5 }
  0x18   :  { %158 = shalt.err (!%p155_p7)
}
  0x19   :  { %s163_s19 = smov 128   ;;  %s164_s20 = smov 8  }
  0x1a   :  { %127 = dma.vmem_to_hbm [thread:$0]  %s122_s11, 1024, %s254_s4, [#allocation3], %s163_s19, %s163_s19, %s164_s20  }
  0x1b   :  { %159 = dma.done.wait [#allocation3], 1024  }
  0x1c   :  { %160 = vsyncadd [#allocation3], 4294966272 }
  0x1d   :  { %131 = vsyncpa [#allocation3], 1 }

</bundles_post_ra>
